<compile_context>
chip_gen: v6e
topology: v6e:2x2x1
jax: 0.10.0
libtpu: 0.0.40
codegen_flags: <defaults>
</compile_context>

<pallas_src>
import jax
import jax.numpy as jnp
from jax import lax
from jax.experimental import pallas as pl
from jax.experimental.pallas import tpu as pltpu


# ----------------------------------------------------------------------------- helpers
def _round_up(x, m):
    return ((x + m - 1) // m) * m


def _largest_dividing_tile(dim, target, align):
    """Largest multiple of `align`, <= min(target, dim), that divides `dim`.
    `dim` must already be a multiple of `align`."""
    cap = min(target, dim)
    best = align
    t = align
    while t <= cap:
        if dim % t == 0:
            best = t
        t += align
    return best


def _pick_tile_and_pad(dim, target, align):
    """Choose (tile, padded_dim).

    Prefer padding `dim` only up to the 8/128 hardware alignment and picking the
    largest tile <= target that divides it (no full padded HBM copy for already
    aligned shapes). If the best dividing tile is pathologically small (e.g.
    dim = 8 * large prime), fall back to padding up to a full tile instead.
    """
    target = max(align, (target // align) * align)
    padded = _round_up(dim, align)
    tile = _largest_dividing_tile(padded, target, align)
    cap = min(target, padded)
    if tile * 4 < cap:               # dividing tile would be tiny -> pad to full tile
        tile = cap
        padded = _round_up(dim, tile)
    return tile, padded


def _vmem_capacity_bytes():
    try:
        return int(pltpu.get_tpu_info().vmem_capacity_bytes)
    except Exception:
        return 64 << 20              # conservative default (v7x per-TC VMEM)


def _working_set_bytes(tm, tn, tk, in_item, out_item, multi_k, w_bufs=2):
    ws = 2 * tm * tk * in_item       # x tiles, double buffered
    ws += w_bufs * tn * tk * in_item  # weight tiles
    ws += 2 * tm * tn * out_item     # output tiles
    ws += 2 * tn * 4                 # bias tile (worst case)
    if multi_k:
        ws += tm * tn * 4            # f32 accumulator scratch
    return ws


# ----------------------------------------------------------------------------- kernels
def _make_kernel(has_bias, multi_k):
    def _dot(x, w):
        # NT contraction on K: consumes the native (out_features, in_features)
        # weight layout directly. This is the MXU-native form (identical to the
        # q.k^T pattern in flash attention) — no per-step XLU transpose of the
        # weight tile and no host-side W.T pass over HBM.
        return lax.dot_general(
            x, w,
            dimension_numbers=(((1,), (1,)), ((), ())),
            preferred_element_type=jnp.float32)

    if not multi_k:
        # Single K step (weight-resident / small-K path): no scratch accumulator,
        # result is written straight to o_ref (saves an acc read-modify-write).
        def kernel(*refs):
            if has_bias:
                x_ref, w_ref, b_ref, o_ref = refs
            else:
                x_ref, w_ref, o_ref = refs
            acc = _dot(x_ref[...], w_ref[...])
            if has_bias:
                acc = acc + b_ref[...].astype(jnp.float32)
            o_ref[...] = acc.astype(o_ref.dtype)
        return kernel

    def kernel(*refs):
        if has_bias:
            x_ref, w_ref, b_ref, o_ref, acc_ref = refs
        else:
            x_ref, w_ref, o_ref, acc_ref = refs
        k = pl.program_id(2)

        @pl.when(k == 0)
        def _init():
            acc_ref[...] = jnp.zeros_like(acc_ref)

        acc_ref[...] += _dot(x_ref[...], w_ref[...])

        @pl.when(k == pl.num_programs(2) - 1)
        def _finalize():
            r = acc_ref[...]
            if has_bias:
                # bias added once, in the K-epilogue only
                r = r + b_ref[...].astype(jnp.float32)
            o_ref[...] = r.astype(o_ref.dtype)
    return kernel


# ----------------------------------------------------------------------------- wrapper
def new_linear_forward(x, weight, bias=None, *, tm=512, tn=512, tk=1024,
                       compute_dtype=None, weight_resident=None):
    """Pallas implementation of new_linear.forward.

    x:      (..., in_features)
    weight: (out_features, in_features)      -- nn.Linear convention
    bias:   (out_features,) or None
    compute_dtype: optionally cast x/W (not the accumulator) to e.g. bf16 for
        the v6e/v7x MXU. Default None = keep input dtype (exact semantics).
    weight_resident: None = auto; True/False to force the fast path selection.
    """
    out_features, in_features = weight.shape
    N, K = out_features, in_features
    lead_shape = x.shape[:-1]
    M = 1
    for d in lead_shape:
        M *= d

    out_dtype = x.dtype
    x2d = x.reshape(M, K)
    w2d = weight
    if compute_dtype is not None and jnp.dtype(compute_dtype) != x2d.dtype:
        x2d = x2d.astype(compute_dtype)
        w2d = w2d.astype(compute_dtype)
    in_item = jnp.dtype(x2d.dtype).itemsize
    out_item = jnp.dtype(out_dtype).itemsize

    vmem_cap = _vmem_capacity_bytes()
    # Keep the double-buffered working set well inside per-core VMEM
    # (v7x: 64 MiB; v5e/v6e: 128 MiB).
    budget = int(vmem_cap * 0.4)

    Mp_min, Np_min, Kp_min = _round_up(M, 8), _round_up(N, 128), _round_up(K, 128)

    # ----- weight-resident fast path: W DMA'd exactly once, regardless of M ----
    w_bytes = Np_min * Kp_min * in_item
    if weight_resident is None:
        use_resident = 2 * w_bytes <= budget // 2
    else:
        use_resident = bool(weight_resident) and 2 * w_bytes <= budget

    if use_resident:
        tn_, Np = Np_min, Np_min
        tk_, Kp = Kp_min, Kp_min
        rem = max(budget - 2 * w_bytes, 8 * (2 * Kp * in_item + 2 * Np * out_item))
        per_row = 2 * tk_ * in_item + 2 * tn_ * out_item
        tm_cap = max(8, (rem // per_row) // 8 * 8)
        tm_, Mp = _pick_tile_and_pad(M, min(max(tm, 8) * 2, tm_cap), 8)
    else:
        tk_, Kp = _pick_tile_and_pad(K, tk, 128)
        tn_, Np = _pick_tile_and_pad(N, tn, 128)
        tm_, Mp = _pick_tile_and_pad(M, tm, 8)
        for _ in range(16):
            if _working_set_bytes(tm_, tn_, tk_, in_item, out_item, Kp > tk_) <= budget:
                break
            if tk_ > 128:
                tk_, Kp = _pick_tile_and_pad(K, tk_ // 2, 128)
            elif tn_ > 128:
                tn_, Np = _pick_tile_and_pad(N, tn_ // 2, 128)
            elif tm_ > 8:
                tm_, Mp = _pick_tile_and_pad(M, tm_ // 2, 8)
            else:
                break
        # Keep both v7x TensorCores busy: ensure at least one "parallel" grid
        # axis has >= 2 blocks when the problem allows it.
        if Mp // tm_ == 1 and Np // tn_ == 1 and Np >= 256:
            tn_, Np = _pick_tile_and_pad(N, max(128, (Np // 2) // 128 * 128), 128)

    multi_k = (Kp // tk_) > 1

    # ----- pad operands only when actually needed (no-op for aligned shapes) ---
    xp = x2d if (Mp, Kp) == (M, K) else jnp.pad(x2d, ((0, Mp - M), (0, Kp - K)))
    wp = w2d if (Np, Kp) == (N, K) else jnp.pad(w2d, ((0, Np - N), (0, Kp - K)))

    grid = (Mp // tm_, Np // tn_, Kp // tk_)
    grid_m, grid_n, _ = grid

    x_spec = pl.BlockSpec((tm_, tk_), lambda i, j, k: (i, k))
    w_spec = pl.BlockSpec((tn_, tk_), lambda i, j, k: (j, k))
    o_spec = pl.BlockSpec((tm_, tn_), lambda i, j, k: (i, j))
    scratch = [pltpu.VMEM((tm_, tn_), jnp.float32)] if multi_k else []

    # Honest traffic estimate: x re-read per N block, W re-read per M block
    # (once if resident), output written once.
    w_reads = 1 if use_resident else grid_m
    cost = pl.CostEstimate(
        flops=2 * Mp * Np * Kp,
        transcendentals=0,
        bytes_accessed=(Mp * Kp * in_item) * grid_n
                       + (Np * Kp * in_item) * w_reads
                       + Mp * Np * out_item)

    ws = _working_set_bytes(tm_, tn_, tk_, in_item, out_item, multi_k)
    vmem_limit = min(int(ws * 1.3) + (2 << 20), int(vmem_cap * 0.9))
    vmem_limit = max(vmem_limit, min(int(vmem_cap * 0.9), 16 << 20))
    compiler_params = pltpu.CompilerParams(
        dimension_semantics=("parallel", "parallel", "arbitrary"),
        vmem_limit_bytes=vmem_limit)

    has_bias = bias is not None
    kernel = _make_kernel(has_bias, multi_k)

    in_specs = [x_spec, w_spec]
    operands = [xp, wp]
    if has_bias:
        bp = bias if Np == N else jnp.pad(bias, ((0, Np - N),))
        bp = bp.reshape(1, Np)
        in_specs.append(pl.BlockSpec((1, tn_), lambda i, j, k: (0, j)))
        operands.append(bp)

    y2d = pl.pallas_call(
        kernel,
        out_shape=jax.ShapeDtypeStruct((Mp, Np), out_dtype),
        grid_spec=pltpu.PrefetchScalarGridSpec(
            num_scalar_prefetch=0,
            grid=grid,
            in_specs=in_specs,
            out_specs=o_spec,
            scratch_shapes=scratch),
        compiler_params=compiler_params,
        cost_estimate=cost,
    )(*operands)

    if (Mp, Np) != (M, N):
        y2d = y2d[:M, :N]
    return y2d.reshape(*lead_shape, N)


# ----------------------------------------------------------------------------- test
if __name__ == "__main__":
    key = jax.random.PRNGKey(0)
    k_x, k_w, k_b = jax.random.split(key, 3)

    batch, seq, in_features, out_features = 2, 8, 32, 64

    x = jax.random.normal(k_x, (batch, seq, in_features), dtype=jnp.float32)
    weight = jax.random.normal(k_w, (out_features, in_features), dtype=jnp.float32) * 0.05
    bias = jax.random.normal(k_b, (out_features,), dtype=jnp.float32) * 0.1

    # Bias path (weight-resident, single-K kernel).
    y = jax.block_until_ready(new_linear_forward(x, weight, bias))
    # bias=None path.
    y_nb = jax.block_until_ready(new_linear_forward(x, weight, None))
    # Optional bf16 compute path (f32 accumulation preserved).
    y_bf = jax.block_until_ready(
        new_linear_forward(x, weight, bias, compute_dtype=jnp.bfloat16))

    # General tiled path: multi-block grid in M, N and K with ragged (padded)
    # N and K, forced off the weight-resident fast path so the f32 scratch
    # accumulator / K-epilogue logic is exercised.
    k_x2, k_w2, k_b2 = jax.random.split(jax.random.PRNGKey(1), 3)
    M2, K2, N2 = 384, 600, 320
    x2 = jax.random.normal(k_x2, (M2, K2), dtype=jnp.float32)
    w2 = jax.random.normal(k_w2, (N2, K2), dtype=jnp.float32) * 0.02
    b2 = jax.random.normal(k_b2, (N2,), dtype=jnp.float32) * 0.1
    y2 = jax.block_until_ready(
        new_linear_forward(x2, w2, b2, tm=128, tn=128, tk=256, weight_resident=False))
    y2_nb = jax.block_until_ready(
        new_linear_forward(x2, w2, None, tm=128, tn=128, tk=256, weight_resident=False))

    # Reference checks in plain JAX.
    ref = x @ weight.T + bias
    ref_nb = x @ weight.T
    ref2 = x2 @ w2.T + b2
    ref2_nb = x2 @ w2.T
    assert y.shape == (batch, seq, out_features)
    assert jnp.allclose(y, ref, atol=1e-4, rtol=1e-4)
    assert jnp.allclose(y_nb, ref_nb, atol=1e-4, rtol=1e-4)
    assert jnp.allclose(y_bf, ref, atol=5e-2, rtol=5e-2)
    assert jnp.allclose(y2, ref2, atol=1e-3, rtol=1e-3)
    assert jnp.allclose(y2_nb, ref2_nb, atol=1e-3, rtol=1e-3)

    print("KERNEL_OK")
</pallas_src>

<mosaic_0001>
module attributes {stable_mosaic.version = 11 : i64} {
  func.func @kernel(%arg0: i32, %arg1: i32, %arg2: i32, %arg3: memref<16x128xf32, #tpu.memory_space<vmem>>, %arg4: memref<128x128xf32, #tpu.memory_space<vmem>>, %arg5: memref<1x128xf32, #tpu.memory_space<vmem>>, %arg6: memref<16x128xf32, #tpu.memory_space<vmem>>) attributes {dimension_semantics = [#tpu.dimension_semantics<parallel>, #tpu.dimension_semantics<parallel>, #tpu.dimension_semantics<arbitrary>], iteration_bounds = array<i64: 1, 1, 1>, scalar_prefetch = 0 : i64, scratch_operands = 0 : i64, tpu.core_type = #tpu.core_type<tc>, window_params = [{transform_indices = @transform_0, window_bounds = array<i64: 16, 128>}, {transform_indices = @transform_1, window_bounds = array<i64: 128, 128>}, {transform_indices = @transform_2, window_bounds = array<i64: 1, 128>}, {transform_indices = @transform_3, window_bounds = array<i64: 16, 128>}]} {
    %c0 = arith.constant 0 : index
    %c0_0 = arith.constant 0 : index
    %0 = vector.load %arg3[%c0, %c0_0] : memref<16x128xf32, #tpu.memory_space<vmem>>, vector<16x128xf32>
    %c0_1 = arith.constant 0 : index
    %c0_2 = arith.constant 0 : index
    %1 = vector.load %arg4[%c0_1, %c0_2] : memref<128x128xf32, #tpu.memory_space<vmem>>, vector<128x128xf32>
    %cst = arith.constant dense<0.000000e+00> : vector<16x128xf32>
    %2 = tpu.matmul %0, %1, %cst {dimension_numbers = #tpu.dot_dimension_numbers<[1], [1], [0], [0], [0, 0, 1, 0], [], []>} : vector<16x128xf32>, vector<128x128xf32>, vector<16x128xf32> -> vector<16x128xf32>
    %c0_3 = arith.constant 0 : index
    %c0_4 = arith.constant 0 : index
    %3 = vector.load %arg5[%c0_3, %c0_4] : memref<1x128xf32, #tpu.memory_space<vmem>>, vector<1x128xf32>
    %4 = vector.broadcast %3 : vector<1x128xf32> to vector<16x128xf32>
    %5 = arith.addf %2, %4 : vector<16x128xf32>
    %c0_5 = arith.constant 0 : index
    %c0_6 = arith.constant 0 : index
    %6 = vector.load %arg6[%c0_5, %c0_6] : memref<16x128xf32, #tpu.memory_space<vmem>>, vector<16x128xf32>
    tpu.vector_store %arg6[%c0_5, %c0_6], %5 {strides = array<i32>} : memref<16x128xf32, #tpu.memory_space<vmem>>, vector<16x128xf32>,
    return
  }
  func.func @transform_0(%arg0: i32, %arg1: i32, %arg2: i32) -> (i32, i32) {
    %c0_i32 = arith.constant 0 : i32
    return %arg0, %arg2 : i32, i32
  }
  func.func @transform_1(%arg0: i32, %arg1: i32, %arg2: i32) -> (i32, i32) {
    %c0_i32 = arith.constant 0 : i32
    return %arg1, %arg2 : i32, i32
  }
  func.func @transform_2(%arg0: i32, %arg1: i32, %arg2: i32) -> (i32, i32) {
    %c0_i32 = arith.constant 0 : i32
    %c0_i32_0 = arith.constant 0 : i32
    return %c0_i32, %arg1 : i32, i32
  }
  func.func @transform_3(%arg0: i32, %arg1: i32, %arg2: i32) -> (i32, i32) {
    %c0_i32 = arith.constant 0 : i32
    return %arg0, %arg1 : i32, i32
  }
}

</mosaic_0001>

<bundles_post_ra>
// kernel: tpu_custom_call.1
= control target key start
LH: loop header
LB: loop body
LE: loop exit
PB: predicated region body
PF: predicated region fallthrough
CT: control target
= control target key end

     0   :  { %8 = vsyncpa [#allocation3], 0  ;;  %s334_s0 = inlined_call_operand.hbm [shape: f32[16,128], index: 0, kind: input, shape index: {}]   ;;  %s335_s1 = inlined_call_operand.hbm [shape: f32[128,128], index: 1, kind: input, shape index: {}]   ;;  %s336_s2 = inlined_call_operand.vmem [shape: f32[1,128], index: 2, kind: input, shape index: {}]   ;;  %s337_s3 = inlined_call_operand.hbm [shape: f32[16,128], index: 3, kind: output, shape index: {}]  }
   0x1   :  { %9 = vsyncpa [#allocation6], 0 }
   0x2   :  { %10 = vsyncpa [#allocation4], 0  ;;  %s288_s12 = smov [#allocation2]  }
   0x3   :  { %s16_s13 = sshll.u32 %s288_s12, 4  ;;  %s17_s13 = int_to_ptr.vmem [resolvable:$true] %s16_s13 }
   0x4   :  { %s230_s14 = scalar_lea.vmem %s17_s13, 256  ;;  %p235_p1 = scmp.lt.s32.totalorder %s17_s13, %s17_s13 }
   0x5   :  { %p231_p0 = scmp.ne.s32.totalorder %s17_s13, %s230_s14  ;;  %p236_p2 = scmp.lt.s32.totalorder %s230_s14, %s230_s14 }
   0x7   :  { %p237_p3 = por %p236_p2, %p235_p1 }
   0x9   :  { %p238_p4 = pnand %p237_p3, %p231_p0 }
   0xb   :  { %241 = shalt.err (!%p238_p4)
}
   0xc   :  { %s289_s15 = smov 128   ;;  %s290_s16 = smov 8  }
   0xd   :  { %22 = dma.hbm_to_vmem [thread:$0]  %s334_s0, 256, %s17_s13, [#allocation3], %s289_s15, %s289_s15, %s290_s16  }
   0xe   :  { %s291_s19 = smov [#allocation5]  }
   0xf   :  { %s28_s20 = sshll.u32 %s291_s19, 4  ;;  %s29_s20 = int_to_ptr.vmem [resolvable:$true] %s28_s20 }
  0x10   :  { %s250_s21 = scalar_lea.vmem %s29_s20, 2048  ;;  %p255_p6 = scmp.lt.s32.totalorder %s29_s20, %s29_s20 }
  0x11   :  { %p251_p5 = scmp.ne.s32.totalorder %s29_s20, %s250_s21  ;;  %p256_p7 = scmp.lt.s32.totalorder %s250_s21, %s250_s21 }
  0x13   :  { %p257_p8 = por %p256_p7, %p255_p6 }
  0x15   :  { %p258_p9 = pnand %p257_p8, %p251_p5 }
  0x17   :  { %261 = shalt.err (!%p258_p9)
}
  0x18   :  { %34 = dma.hbm_to_vmem [thread:$0]  %s335_s1, 2048, %s29_s20, [#allocation6], %s289_s15, %s289_s15, %s290_s16  }
  0x19   :  { %282 = dma.done.wait [#allocation3], 256  }
  0x1a   :  { %283 = vsyncadd [#allocation3], 4294967040 }
  0x1b   :  { %284 = dma.done.wait [#allocation6], 2048  }
  0x1c   :  { %285 = vsyncadd [#allocation6], 4294965248  ;;  %v60_v0 = vld [vmem:[#allocation5 + $0x78] sm:$0xff]  ;;  %v59_v1 = vld [vmem:[#allocation5 + $0x70] sm:$0xff]  ;;  %s292_s24 = smov [#allocation7]  }
  0x1d   :  { %182 = vmatprep.subr.mxu0 %v60_v0  ;;  %v58_v2 = vld [vmem:[#allocation5 + $0x68] sm:$0xff]  ;;  %v43_v3 = vld [vmem:[#allocation2] sm:$0xff]  ;;  %v57_v4 = vld [vmem:[#allocation5 + $0x60] sm:$0xff]  ;;  %s150_s25 = sshll.u32 %s292_s24, 4  ;;  %s151_s25 = int_to_ptr.vmem [resolvable:$true] %s150_s25 }
  0x1e   :  { %183 = vmatpush3.xpose.msra.mxu0 %v60_v0  ;;  %214 = vmatprep.mubr.f32.mxu0 %v43_v3  ;;  %v56_v5 = vld [vmem:[#allocation5 + $0x58] sm:$0xff]  ;;  %v55_v6 = vld [vmem:[#allocation5 + $0x50] sm:$0xff]  ;;  %v54_v7 = vld [vmem:[#allocation5 + $0x48] sm:$0xff]  ;;  %s262_s26 = scalar_lea.vmem %s151_s25, 256  ;;  %p267_p11 = scmp.lt.s32.totalorder %s151_s25, %s151_s25 }
  0x1f   :  { %184 = vmatprep.subr.mxu0 %v59_v1  ;;  %v53_v8 = vld [vmem:[#allocation5 + $0x40] sm:$0xff]  ;;  %v52_v9 = vld [vmem:[#allocation5 + $0x38] sm:$0xff]  ;;  %v51_v10 = vld [vmem:[#allocation5 + $0x30] sm:$0xff]  ;;  %p263_p10 = scmp.ne.s32.totalorder %s151_s25, %s262_s26  ;;  %p268_p12 = scmp.lt.s32.totalorder %s262_s26, %s262_s26 }
  0x20   :  { %v50_v11 = vld [vmem:[#allocation5 + $0x28] sm:$0xff]  ;;  %v49_v12 = vld [vmem:[#allocation5 + $0x20] sm:$0xff]  ;;  %v48_v13 = vld [vmem:[#allocation5 + $0x18] sm:$0xff] }
  0x21   :  { %v47_v14 = vld [vmem:[#allocation5 + $0x10] sm:$0xff]  ;;  %v46_v15 = vld [vmem:[#allocation5 + $0x8] sm:$0xff]  ;;  %v45_v16 = vld [vmem:[#allocation5] sm:$0xff]  ;;  %p269_p13 = por %p268_p12, %p267_p11 }
  0x22   :  { %185 = vmatpush3.xpose.msra.mxu0 %v59_v1  ;;  %v44_v17 = vld [vmem:[#allocation2 + $0x8] sm:$0xff]  ;;  %v163_v18 = vld [vmem:[%s336_s2] ss:$0 sm:$0xff] }
  0x23   :  { %186 = vmatprep.subr.mxu0 %v58_v2  ;;  %p270_p0 = pnand %p269_p13, %p263_p10 }
  0x26   :  { %187 = vmatpush3.xpose.msra.mxu0 %v58_v2 }
  0x27   :  { %188 = vmatprep.subr.mxu0 %v57_v4 }
  0x2a   :  { %189 = vmatpush3.xpose.msra.mxu0 %v57_v4 }
  0x2b   :  { %190 = vmatprep.subr.mxu0 %v56_v5 }
  0x2e   :  { %191 = vmatpush3.xpose.msra.mxu0 %v56_v5 }
  0x2f   :  { %192 = vmatprep.subr.mxu0 %v55_v6 }
  0x32   :  { %193 = vmatpush3.xpose.msra.mxu0 %v55_v6 }
  0x33   :  { %194 = vmatprep.subr.mxu0 %v54_v7 }
  0x36   :  { %195 = vmatpush3.xpose.msra.mxu0 %v54_v7 }
  0x37   :  { %196 = vmatprep.subr.mxu0 %v53_v8 }
  0x3a   :  { %197 = vmatpush3.xpose.msra.mxu0 %v53_v8 }
  0x3b   :  { %198 = vmatprep.subr.mxu0 %v52_v9 }
  0x3e   :  { %199 = vmatpush3.xpose.msra.mxu0 %v52_v9 }
  0x3f   :  { %200 = vmatprep.subr.mxu0 %v51_v10 }
  0x42   :  { %201 = vmatpush3.xpose.msra.mxu0 %v51_v10 }
  0x43   :  { %202 = vmatprep.subr.mxu0 %v50_v11 }
  0x46   :  { %203 = vmatpush3.xpose.msra.mxu0 %v50_v11 }
  0x47   :  { %204 = vmatprep.subr.mxu0 %v49_v12 }
  0x4a   :  { %205 = vmatpush3.xpose.msra.mxu0 %v49_v12 }
  0x4b   :  { %206 = vmatprep.subr.mxu0 %v48_v13 }
  0x4e   :  { %207 = vmatpush3.xpose.msra.mxu0 %v48_v13 }
  0x4f   :  { %208 = vmatprep.subr.mxu0 %v47_v14 }
  0x52   :  { %209 = vmatpush3.xpose.msra.mxu0 %v47_v14 }
  0x53   :  { %210 = vmatprep.subr.mxu0 %v46_v15 }
  0x56   :  { %211 = vmatpush3.xpose.msra.mxu0 %v46_v15 }
  0x57   :  { %212 = vmatprep.subr.mxu0 %v45_v16 }
  0x5a   :  { %213 = vmatpush3.xpose.msra.mxu0 %v45_v16 }
  0x5d   :  { %215 = vmatmul.mubr.f32.vlgmr.msra.gmra.mxu0 %v44_v17 }
 0x11d   :  { %v216_v19 = vpop.f32.mrf.mxu0 }
 0x11e   :  { %v140_v20 = vadd.f32 %v216_v19, %v163_v18 }
 0x11f   :  { %v134_v21 = vpop.f32.mrf.mxu0 }
 0x120   :  { %144 = vst [vmem:[#allocation7 + $0x8] sm:$0xff] %v140_v20  ;;  %v135_v22 = vadd.f32 %v163_v18, %v134_v21 }
 0x122   :  { %143 = vst [vmem:[#allocation7] sm:$0xff] %v135_v22 }
 0x123   :  { %273 = shalt.err (!%p270_p0)
}
 0x124   :  { %156 = dma.vmem_to_hbm [thread:$0]  %s151_s25, 256, %s337_s3, [#allocation4], %s289_s15, %s289_s15, %s290_s16  }
 0x125   :  { %286 = dma.done.wait [#allocation4], 256  }
 0x126   :  { %287 = vsyncadd [#allocation4], 4294967040 }
 0x127   :  { %160 = vsyncpa [#allocation3], 1 }
 0x128   :  { %161 = vsyncpa [#allocation6], 1 }
 0x129   :  { %162 = vsyncpa [#allocation4], 1 }

</bundles_post_ra>
